<compile_context>
chip_gen: v7x
topology: tpu7x:2x2x1
jax: 0.10.0
libtpu: 0.0.40
codegen_flags: <defaults>
</compile_context>

<pallas_src>
import numpy as np

import jax
import jax.numpy as jnp
from jax.experimental import pallas as pl
from jax.experimental.pallas import tpu as pltpu

N_OUT = 10    # real number of classes
N_PAD = 128   # lane-dense padded output width (one full vreg lane dim)


def lin_generator_kernel(x_ref, w_ref, b_ref, o_ref):
    # Single fused linear layer on the MXU, accumulate in f32.
    h = jnp.dot(x_ref[...], w_ref[...], preferred_element_type=jnp.float32) + b_ref[...]

    # Numerically stable log_softmax over dim=0 (batch axis), all in f32.
    # Padded lanes (cols >= 10) see h == 0 for every row, so they stay finite
    # and are discarded by the wrapper slice.
    m = jnp.max(h, axis=0, keepdims=True)                        # XLU
    z = h - m                                                    # VPU
    lse = jnp.log(jnp.sum(jnp.exp(z), axis=0, keepdims=True))    # EUP + XLU
    o_ref[...] = (z - lse).astype(o_ref.dtype)                   # unmasked vst


def fuse_params(w1, b1, w2, b2, w3, b3):
    """Collapse the three activation-free Linear layers into one (in f64),
    then zero-pad the output dim from 10 to 128 lanes.

    Exact algebra (static one-time precompute):
        h = ((x W1 + b1) W2 + b2) W3 + b3 = x (W1 W2 W3) + ((b1 W2 + b2) W3 + b3)
    """
    w1, b1, w2, b2, w3, b3 = (
        np.asarray(jax.device_get(a), dtype=np.float64)
        for a in (w1, b1, w2, b2, w3, b3)
    )
    w = w1 @ w2 @ w3                      # (784, 10) in f64
    b = (b1 @ w2 + b2) @ w3 + b3          # (1, 10)   in f64

    w_pad = np.zeros((w.shape[0], N_PAD), dtype=np.float32)
    w_pad[:, :N_OUT] = w.astype(np.float32)
    b_pad = np.zeros((1, N_PAD), dtype=np.float32)
    b_pad[:, :N_OUT] = b.astype(np.float32)
    return jnp.asarray(w_pad), jnp.asarray(b_pad)


def lin_generator_forward(x, w_fused, b_fused):
    B, K = x.shape
    # Advisory cost hint: this call is launch/DMA-latency bound (~0.5 MB total),
    # let XLA overlap it with surrounding work.
    cost = pl.CostEstimate(
        flops=2 * B * K * N_PAD + 4 * B * N_PAD,
        transcendentals=B * N_PAD + N_PAD,
        bytes_accessed=4 * (x.size + w_fused.size + b_fused.size + B * N_PAD),
    )
    out_padded = pl.pallas_call(
        lin_generator_kernel,
        out_shape=jax.ShapeDtypeStruct((B, N_PAD), jnp.float32),
        in_specs=[pl.BlockSpec(memory_space=pltpu.MemorySpace.VMEM)] * 3,
        out_specs=pl.BlockSpec(memory_space=pltpu.MemorySpace.VMEM),
        cost_estimate=cost,
    )(x, w_fused, b_fused)
    return out_padded[:, :N_OUT]


def init_params(key):
    # Deterministic synthetic init (PyTorch-like uniform bounds); shapes match
    # nn.Linear(784,256), nn.Linear(256,64), nn.Linear(64,10); weights stored
    # as (in, out).
    dims = [(784, 256), (256, 64), (64, 10)]
    params = []
    for (fan_in, fan_out) in dims:
        key, kw, kb = jax.random.split(key, 3)
        bound = 1.0 / jnp.sqrt(float(fan_in))
        w = jax.random.uniform(kw, (fan_in, fan_out), jnp.float32, -bound, bound)
        b = jax.random.uniform(kb, (1, fan_out), jnp.float32, -bound, bound)
        params += [w, b]
    return params


def reference_forward(x, w1, b1, w2, b2, w3, b3):
    # Mirrors the PyTorch module layer-by-layer (no fusion) for verification.
    h = x @ w1 + b1
    h = h @ w2 + b2
    h = h @ w3 + b3
    return jax.nn.log_softmax(h, axis=0)


if __name__ == "__main__":
    key = jax.random.PRNGKey(0)
    key, kx = jax.random.split(key)
    B = 8
    x = jax.random.normal(kx, (B, 784), jnp.float32)

    w1, b1, w2, b2, w3, b3 = init_params(key)

    # One-time static weight fusion + lane padding (cached alongside params).
    w_fused, b_fused = fuse_params(w1, b1, w2, b2, w3, b3)

    out = lin_generator_forward(x, w_fused, b_fused)
    out = jax.block_until_ready(out)

    ref = reference_forward(x, w1, b1, w2, b2, w3, b3)
    assert out.shape == (B, N_OUT)
    assert jnp.allclose(out, ref, atol=1e-4, rtol=1e-4), "mismatch vs reference"
    print("KERNEL_OK")
</pallas_src>

<mosaic_0001>
module attributes {stable_mosaic.version = 11 : i64} {
  func.func @lin_generator_kernel(%arg0: memref<8x784xf32, #tpu.memory_space<vmem>>, %arg1: memref<784x128xf32, #tpu.memory_space<vmem>>, %arg2: memref<1x128xf32, #tpu.memory_space<vmem>>, %arg3: memref<8x128xf32, #tpu.memory_space<vmem>>) attributes {dimension_semantics = [], scalar_prefetch = 0 : i64, scratch_operands = 0 : i64, tpu.core_type = #tpu.core_type<tc>} {
    %c0 = arith.constant 0 : index
    %c0_0 = arith.constant 0 : index
    %0 = vector.load %arg0[%c0, %c0_0] : memref<8x784xf32, #tpu.memory_space<vmem>>, vector<8x784xf32>
    %c0_1 = arith.constant 0 : index
    %c0_2 = arith.constant 0 : index
    %1 = vector.load %arg1[%c0_1, %c0_2] : memref<784x128xf32, #tpu.memory_space<vmem>>, vector<784x128xf32>
    %cst = arith.constant dense<0.000000e+00> : vector<8x128xf32>
    %2 = tpu.matmul %0, %1, %cst {dimension_numbers = #tpu.dot_dimension_numbers<[1], [0], [0], [1], [0, 0, 1, 1], [], []>} : vector<8x784xf32>, vector<784x128xf32>, vector<8x128xf32> -> vector<8x128xf32>
    %c0_3 = arith.constant 0 : index
    %c0_4 = arith.constant 0 : index
    %3 = vector.load %arg2[%c0_3, %c0_4] : memref<1x128xf32, #tpu.memory_space<vmem>>, vector<1x128xf32>
    %4 = vector.broadcast %3 : vector<1x128xf32> to vector<8x128xf32>
    %5 = arith.addf %2, %4 : vector<8x128xf32>
    %cst_5 = arith.constant dense<0xFF800000> : vector<128xf32>
    %6 = vector.multi_reduction <maximumf>, %5, %cst_5 [0] : vector<8x128xf32> to vector<128xf32>
    %7 = vector.shape_cast %6 : vector<128xf32> to vector<1x128xf32>
    %8 = vector.broadcast %7 : vector<1x128xf32> to vector<8x128xf32>
    %9 = arith.subf %5, %8 : vector<8x128xf32>
    %10 = math.exp %9 : vector<8x128xf32>
    %cst_6 = arith.constant dense<0.000000e+00> : vector<128xf32>
    %11 = vector.multi_reduction <add>, %10, %cst_6 [0] : vector<8x128xf32> to vector<128xf32>
    %12 = vector.shape_cast %11 : vector<128xf32> to vector<1x128xf32>
    %13 = math.log %12 : vector<1x128xf32>
    %14 = vector.broadcast %13 : vector<1x128xf32> to vector<8x128xf32>
    %15 = arith.subf %9, %14 : vector<8x128xf32>
    %c0_7 = arith.constant 0 : index
    %c0_8 = arith.constant 0 : index
    %16 = vector.load %arg3[%c0_7, %c0_8] : memref<8x128xf32, #tpu.memory_space<vmem>>, vector<8x128xf32>
    tpu.vector_store %arg3[%c0_7, %c0_8], %15 {strides = array<i32>} : memref<8x128xf32, #tpu.memory_space<vmem>>, vector<8x128xf32>,
    return
  }
}

</mosaic_0001>

<bundles_post_ra>
// kernel: tpu_custom_call.1
= control target key start
LH: loop header
LB: loop body
LE: loop exit
PB: predicated region body
PF: predicated region fallthrough
CT: control target
= control target key end

     0   :  { %8 = vsyncpa [#allocation3], 0  ;;  %s846_s0 = inlined_call_operand.hbm [shape: f32[8,784], index: 0, kind: input, shape index: {}]   ;;  %s847_s1 = inlined_call_operand.hbm [shape: f32[784,128], index: 1, kind: input, shape index: {}]   ;;  %s848_s2 = inlined_call_operand.vmem [shape: f32[1,128], index: 2, kind: input, shape index: {}]   ;;  %s849_s3 = inlined_call_operand.hbm [shape: f32[8,128], index: 3, kind: output, shape index: {}]  }
   0x1   :  { %9 = vsyncpa [#allocation6], 0 }
   0x2   :  { %10 = vsyncpa [#allocation4], 0  ;;  %s772_s12 = smov [#allocation2]   ;;  %s773_s14 = smov [#allocation5]  }
   0x3   :  { %s17_s13 = sshll.u32 %s772_s12, 4  ;;  %s26_s15 = sshll.u32 %s773_s14, 4  ;;  %s18_s13 = int_to_ptr.vmem [resolvable:$true] %s17_s13  ;;  %s800_s15 = int_to_ptr.vmem [resolvable:$true] %s26_s15 }
   0x4   :  { %s700_s18 = scalar_lea.hbm %s846_s0, 896 }
   0x5   :  { %p701_p0 = scmp.ne.s32.totalorder %s846_s0, %s700_s18  ;;  %p704_p1 = scmp.lt.u32.totalorder %s700_s18, %s846_s0 }
   0x7   :  { %p706_p2 = pnand %p704_p1, %p701_p0 }
   0x9   :  { %709 = shalt.err (!%p706_p2)
}
   0xa   :  { %s710_s23 = scalar_lea.vmem %s18_s13, 896  ;;  %p715_p4 = scmp.lt.s32.totalorder %s18_s13, %s18_s13 }
   0xb   :  { %p711_p3 = scmp.ne.s32.totalorder %s18_s13, %s710_s23  ;;  %p716_p5 = scmp.lt.s32.totalorder %s710_s23, %s710_s23 }
   0xd   :  { %p717_p6 = por %p716_p5, %p715_p4 }
   0xf   :  { %p718_p7 = pnand %p717_p6, %p711_p3 }
  0x11   :  { %721 = shalt.err (!%p718_p7)
}
  0x12   :  { %20 = dma.hbm_to_vmem [thread:$0]  %s846_s0, 896, %s18_s13, [#allocation3]  }
  0x13   :  { %s722_s28 = scalar_lea.hbm %s847_s1, 12544 }
  0x14   :  { %p723_p8 = scmp.ne.s32.totalorder %s847_s1, %s722_s28  ;;  %p726_p9 = scmp.lt.u32.totalorder %s722_s28, %s847_s1 }
  0x16   :  { %p728_p10 = pnand %p726_p9, %p723_p8 }
  0x18   :  { %731 = shalt.err (!%p728_p10)
}
  0x19   :  { %s732_s6 = scalar_lea.vmem %s800_s15, 12544  ;;  %p737_p12 = scmp.lt.s32.totalorder %s800_s15, %s800_s15 }
  0x1a   :  { %p733_p11 = scmp.ne.s32.totalorder %s800_s15, %s732_s6  ;;  %p738_p13 = scmp.lt.s32.totalorder %s732_s6, %s732_s6 }
  0x1c   :  { %p739_p0 = por %p738_p13, %p737_p12 }
  0x1e   :  { %p740_p1 = pnand %p739_p0, %p733_p11 }
  0x20   :  { %743 = shalt.err (!%p740_p1)
}
  0x21   :  { %s774_s0 = smov 128   ;;  %s775_s7 = smov 8  }
  0x22   :  { %32 = dma.hbm_to_vmem [thread:$0]  %s847_s1, 12544, %s800_s15, [#allocation6], %s774_s0, %s774_s0, %s775_s7  }
  0x23   :  { %766 = dma.done.wait [#allocation3], 896  }
  0x24   :  { %767 = vsyncadd [#allocation3], 4294966400 }
  0x25   :  { %768 = dma.done.wait [#allocation6], 12544  }
  0x26   :  { %769 = vsyncadd [#allocation6], 4294954752  ;;  %v64_v0 = vld [vmem:[#allocation5 + $0x80] sm:$0xff]  ;;  %v65_v1 = vld [vmem:[#allocation5 + $0x88] sm:$0xff]  ;;  %vm777_vm0 = vmmov 0   ;;  %vm153_vm1 = vcmask 130048  }
  0x27   :  { %v48_v2 = vld [vmem:[#allocation5] sm:$0xff]  ;;  %v589_v3 = vpack.c.bf16 %v65_v1, %v64_v0  ;;  %v49_v4 = vld [vmem:[#allocation5 + $0x8] sm:$0xff]  ;;  %v66_v11 = vld [vmem:[#allocation5 + $0x90] sm:$0xff] }
  0x28   :  { %v96_v5 = vld [vmem:[#allocation5 + $0x180] sm:$0xff]  ;;  %v97_v6 = vld [vmem:[#allocation5 + $0x188] sm:$0xff]  ;;  %v591_v7 = vpack.c.bf16 %v49_v4, %v48_v2  ;;  %v67_v13 = vld [vmem:[#allocation5 + $0x98] sm:$0xff] }
  0x29   :  { %v621_v8 = vpack.c.bf16 %v97_v6, %v96_v5  ;;  %v80_v9 = vld [vmem:[#allocation5 + $0x100] sm:$0xff]  ;;  %v81_v10 = vld [vmem:[#allocation5 + $0x108] sm:$0xff]  ;;  %590 = vmatprep.subr.bf16.mxu0 %v589_v3  ;;  %v50_v14 = vld [vmem:[#allocation5 + $0x10] sm:$0xff]  ;;  %v593_v16 = vpack.c.bf16 %v67_v13, %v66_v11 }
  0x2a   :  { %v623_v12 = vpack.c.bf16 %v81_v10, %v80_v9  ;;  %v51_v15 = vld [vmem:[#allocation5 + $0x18] sm:$0xff]  ;;  %592 = vmatpush3.bf16.msra.mxu0 %v591_v7  ;;  %v98_v18 = vld [vmem:[#allocation5 + $0x190] sm:$0xff]  ;;  %v68_v23 = vld [vmem:[#allocation5 + $0xa0] sm:$0xff] }
  0x2b   :  { %622 = vmatprep.subr.bf16.mxu1 %v621_v8  ;;  %v595_v17 = vpack.c.bf16 %v51_v15, %v50_v14  ;;  %v99_v19 = vld [vmem:[#allocation5 + $0x198] sm:$0xff]  ;;  %v82_v20 = vld [vmem:[#allocation5 + $0x110] sm:$0xff]  ;;  %v69_v24 = vld [vmem:[#allocation5 + $0xa8] sm:$0xff]  ;;  %594 = vmatprep.subr.bf16.mxu0 %v593_v16 }
  0x2c   :  { %624 = vmatpush3.bf16.msra.mxu1 %v623_v12  ;;  %v625_v21 = vpack.c.bf16 %v99_v19, %v98_v18  ;;  %v83_v22 = vld [vmem:[#allocation5 + $0x118] sm:$0xff]  ;;  %v597_v26 = vpack.c.bf16 %v69_v24, %v68_v23  ;;  %v52_v27 = vld [vmem:[#allocation5 + $0x20] sm:$0xff]  ;;  %v53_v28 = vld [vmem:[#allocation5 + $0x28] sm:$0xff] }
  0x2d   :  { %v627_v25 = vpack.c.bf16 %v83_v22, %v82_v20  ;;  %v100_v29 = vld [vmem:[#allocation5 + $0x1a0] sm:$0xff]  ;;  %v101_v30 = vld [vmem:[#allocation5 + $0x1a8] sm:$0xff]  ;;  %v599_v33 = vpack.c.bf16 %v53_v28, %v52_v27  ;;  %v70_v35 = vld [vmem:[#allocation5 + $0xb0] sm:$0xff] }
  0x2e   :  { %626 = vmatprep.subr.bf16.mxu1 %v625_v21  ;;  %v84_v31 = vld [vmem:[#allocation5 + $0x120] sm:$0xff]  ;;  %v85_v32 = vld [vmem:[#allocation5 + $0x128] sm:$0xff]  ;;  %596 = vmatpush3.bf16.msra.mxu0 %v595_v17  ;;  %v629_v34 = vpack.c.bf16 %v101_v30, %v100_v29  ;;  %v71_v36 = vld [vmem:[#allocation5 + $0xb8] sm:$0xff] }
  0x2f   :  { %v54_v37 = vld [vmem:[#allocation5 + $0x30] sm:$0xff]  ;;  %598 = vmatprep.subr.bf16.mxu0 %v597_v26  ;;  %v631_v38 = vpack.c.bf16 %v85_v32, %v84_v31  ;;  %v601_v39 = vpack.c.bf16 %v71_v36, %v70_v35  ;;  %v55_v40 = vld [vmem:[#allocation5 + $0x38] sm:$0xff]  ;;  %v72_v46 = vld [vmem:[#allocation5 + $0xc0] sm:$0xff] }
  0x30   :  { %628 = vmatpush3.bf16.msra.mxu1 %v627_v25  ;;  %v102_v41 = vld [vmem:[#allocation5 + $0x1b0] sm:$0xff]  ;;  %v103_v42 = vld [vmem:[#allocation5 + $0x1b8] sm:$0xff]  ;;  %v73_v47 = vld [vmem:[#allocation5 + $0xc8] sm:$0xff]  ;;  %v603_v48 = vpack.c.bf16 %v55_v40, %v54_v37 }
  0x31   :  { %630 = vmatprep.subr.bf16.mxu1 %v629_v34  ;;  %v633_v43 = vpack.c.bf16 %v103_v42, %v102_v41  ;;  %v86_v44 = vld [vmem:[#allocation5 + $0x130] sm:$0xff]  ;;  %v87_v45 = vld [vmem:[#allocation5 + $0x138] sm:$0xff]  ;;  %v104_v49 = vld [vmem:[#allocation5 + $0x1c0] sm:$0xff]  ;;  %v605_v52 = vpack.c.bf16 %v73_v47, %v72_v46 }
  0x32   :  { %600 = vmatpush3.bf16.msra.mxu0 %v599_v33  ;;  %v105_v50 = vld [vmem:[#allocation5 + $0x1c8] sm:$0xff]  ;;  %v635_v51 = vpack.c.bf16 %v87_v45, %v86_v44  ;;  %v56_v53 = vld [vmem:[#allocation5 + $0x40] sm:$0xff]  ;;  %v74_v58 = vld [vmem:[#allocation5 + $0xd0] sm:$0xff] }
  0x33   :  { %602 = vmatprep.subr.bf16.mxu0 %v601_v39  ;;  %v57_v54 = vld [vmem:[#allocation5 + $0x48] sm:$0xff]  ;;  %v88_v55 = vld [vmem:[#allocation5 + $0x140] sm:$0xff]  ;;  %v637_v56 = vpack.c.bf16 %v105_v50, %v104_v49  ;;  %v75_v59 = vld [vmem:[#allocation5 + $0xd8] sm:$0xff]  ;;  %v776_v50 = vmov 0.0|0.0  }
  0x34   :  { %632 = vmatpush3.bf16.msra.mxu1 %v631_v38  ;;  %v89_v57 = vld [vmem:[#allocation5 + $0x148] sm:$0xff]  ;;  %v106_v60 = vld [vmem:[#allocation5 + $0x1d0] sm:$0xff]  ;;  %v107_v61 = vld [vmem:[#allocation5 + $0x1d8] sm:$0xff]  ;;  %v607_v62 = vpack.c.bf16 %v57_v54, %v56_v53  ;;  %v609_v0 = vpack.c.bf16 %v75_v59, %v74_v58 }
  0x35   :  { %634 = vmatprep.subr.bf16.mxu1 %v633_v43  ;;  %v639_v63 = vpack.c.bf16 %v89_v57, %v88_v55  ;;  %v58_v1 = vld [vmem:[#allocation5 + $0x50] sm:$0xff]  ;;  %v59_v2 = vld [vmem:[#allocation5 + $0x58] sm:$0xff]  ;;  %v641_v4 = vpack.c.bf16 %v107_v61, %v106_v60  ;;  %v76_v6 = vld [vmem:[#allocation5 + $0xe0] sm:$0xff]  ;;  %v778_v60 = vmov 0.0  }
  0x36   :  { %604 = vmatpush3.bf16.msra.mxu0 %v603_v48  ;;  %v90_v3 = vld [vmem:[#allocation5 + $0x150] sm:$0xff]  ;;  %v91_v5 = vld [vmem:[#allocation5 + $0x158] sm:$0xff]  ;;  %v77_v7 = vld [vmem:[#allocation5 + $0xe8] sm:$0xff]  ;;  %v611_v10 = vpack.c.bf16 %v59_v2, %v58_v1 }
  0x37   :  { %606 = vmatprep.subr.bf16.mxu0 %v605_v52  ;;  %v108_v8 = vld [vmem:[#allocation5 + $0x1e0] sm:$0xff]  ;;  %v109_v9 = vld [vmem:[#allocation5 + $0x1e8] sm:$0xff]  ;;  %v42_v12 = vld [vmem:[#allocation2 + $0x8] sm:$0xff]  ;;  %v643_v13 = vpack.c.bf16 %v91_v5, %v90_v3  ;;  %v613_v14 = vpack.c.bf16 %v77_v7, %v76_v6 }
  0x38   :  { %636 = vmatpush3.bf16.msra.mxu1 %v635_v51  ;;  %v60_v11 = vld [vmem:[#allocation5 + $0x60] sm:$0xff]  ;;  %v61_v15 = vld [vmem:[#allocation5 + $0x68] sm:$0xff]  ;;  %v645_v18 = vpack.c.bf16 %v109_v9, %v108_v8  ;;  %v78_v19 = vld [vmem:[#allocation5 + $0xf0] sm:$0xff]  ;;  %221 = vmatprep.mubr.f32.mxu0 %v42_v12 }
  0x39   :  { %638 = vmatprep.subr.bf16.mxu1 %v637_v56  ;;  %v92_v16 = vld [vmem:[#allocation5 + $0x160] sm:$0xff]  ;;  %v93_v17 = vld [vmem:[#allocation5 + $0x168] sm:$0xff]  ;;  %v79_v20 = vld [vmem:[#allocation5 + $0xf8] sm:$0xff]  ;;  %v615_v24 = vpack.c.bf16 %v61_v15, %v60_v11 }
  0x3a   :  { %608 = vmatpush3.bf16.msra.mxu0 %v607_v62  ;;  %v44_v21 = vld [vmem:[#allocation2 + $0x18] sm:$0xff]  ;;  %v110_v22 = vld [vmem:[#allocation5 + $0x1f0] sm:$0xff]  ;;  %v111_v23 = vld [vmem:[#allocation5 + $0x1f8] sm:$0xff]  ;;  %v647_v25 = vpack.c.bf16 %v93_v17, %v92_v16  ;;  %v617_v26 = vpack.c.bf16 %v79_v20, %v78_v19 }
  0x3b   :  { %610 = vmatprep.subr.bf16.mxu0 %v609_v0  ;;  %291 = vmatprep.mubr.f32.mxu1 %v44_v21  ;;  %v62_v27 = vld [vmem:[#allocation5 + $0x70] sm:$0xff]  ;;  %v63_v28 = vld [vmem:[#allocation5 + $0x78] sm:$0xff]  ;;  %v649_v30 = vpack.c.bf16 %v111_v23, %v110_v22  ;;  %v128_v32 = vld [vmem:[#allocation5 + $0x280] sm:$0xff] }
  0x3c   :  { %640 = vmatpush3.bf16.msra.mxu1 %v639_v63  ;;  %v94_v29 = vld [vmem:[#allocation5 + $0x170] sm:$0xff]  ;;  %v95_v31 = vld [vmem:[#allocation5 + $0x178] sm:$0xff]  ;;  %v129_v33 = vld [vmem:[#allocation5 + $0x288] sm:$0xff]  ;;  %v619_v34 = vpack.c.bf16 %v63_v28, %v62_v27 }
  0x3d   :  { %642 = vmatprep.subr.bf16.mxu1 %v641_v4  ;;  %v651_v35 = vpack.c.bf16 %v95_v31, %v94_v29  ;;  %v653_v36 = vpack.c.bf16 %v129_v33, %v128_v32  ;;  %v112_v37 = vld [vmem:[#allocation5 + $0x200] sm:$0xff]  ;;  %v113_v38 = vld [vmem:[#allocation5 + $0x208] sm:$0xff]  ;;  %v130_v39 = vld [vmem:[#allocation5 + $0x290] sm:$0xff] }
  0x3e   :  { %612 = vmatpush3.bf16.msra.mxu0 %v611_v10  ;;  %v131_v40 = vld [vmem:[#allocation5 + $0x298] sm:$0xff]  ;;  %v41_v41 = vld [vmem:[#allocation2] sm:$0xff]  ;;  %v655_v42 = vpack.c.bf16 %v113_v38, %v112_v37  ;;  %v114_v44 = vld [vmem:[#allocation5 + $0x210] sm:$0xff] }
  0x3f   :  { %614 = vmatprep.subr.bf16.mxu0 %v613_v14  ;;  %v43_v43 = vld [vmem:[#allocation2 + $0x10] sm:$0xff]  ;;  %v657_v45 = vpack.c.bf16 %v131_v40, %v130_v39  ;;  %v132_v47 = vld [vmem:[#allocation5 + $0x2a0] sm:$0xff]  ;;  %v133_v48 = vld [vmem:[#allocation5 + $0x2a8] sm:$0xff] }
  0x40   :  { %644 = vmatpush3.bf16.msra.mxu1 %v643_v13  ;;  %v115_v46 = vld [vmem:[#allocation5 + $0x218] sm:$0xff]  ;;  %v46_v49 = vld [vmem:[#allocation2 + $0x28] sm:$0xff]  ;;  %v144_v51 = vld [vmem:[#allocation5 + $0x300] sm:$0xff]  ;;  %v661_v55 = vpack.c.bf16 %v133_v48, %v132_v47 }
  0x41   :  { %646 = vmatprep.subr.bf16.mxu1 %v645_v18  ;;  %v145_v52 = vld [vmem:[#allocation5 + $0x308] sm:$0xff]  ;;  %v659_v54 = vpack.c.bf16 %v115_v46, %v114_v44  ;;  %v116_v56 = vld [vmem:[#allocation5 + $0x220] sm:$0xff]  ;;  %v134_v58 = vld [vmem:[#allocation5 + $0x2b0] sm:$0xff] }
  0x42   :  { %616 = vmatpush3.bf16.msra.mxu0 %v615_v24  ;;  %v686_v53 = vpack.c.bf16 %v145_v52, %v144_v51  ;;  %v117_v57 = vld [vmem:[#allocation5 + $0x228] sm:$0xff]  ;;  %v135_v59 = vld [vmem:[#allocation5 + $0x2b8] sm:$0xff]  ;;  %v118_v0 = vld [vmem:[#allocation5 + $0x230] sm:$0xff] }
  0x43   :  { %618 = vmatprep.subr.bf16.mxu0 %v617_v26  ;;  %v47_v61 = vld [vmem:[#allocation2 + $0x30] sm:$0xff]  ;;  %v663_v62 = vpack.c.bf16 %v117_v57, %v116_v56  ;;  %v665_v63 = vpack.c.bf16 %v135_v59, %v134_v58  ;;  %v136_v2 = vld [vmem:[#allocation5 + $0x2c0] sm:$0xff]  ;;  %v137_v3 = vld [vmem:[#allocation5 + $0x2c8] sm:$0xff] }
  0x44   :  { %648 = vmatpush3.bf16.msra.mxu1 %v647_v25  ;;  %v119_v1 = vld [vmem:[#allocation5 + $0x238] sm:$0xff]  ;;  %v669_v5 = vpack.c.bf16 %v137_v3, %v136_v2  ;;  %v120_v6 = vld [vmem:[#allocation5 + $0x240] sm:$0xff]  ;;  %v121_v7 = vld [vmem:[#allocation5 + $0x248] sm:$0xff] }
  0x45   :  { %650 = vmatprep.subr.bf16.mxu1 %v649_v30  ;;  %v667_v4 = vpack.c.bf16 %v119_v1, %v118_v0  ;;  %v138_v8 = vld [vmem:[#allocation5 + $0x2d0] sm:$0xff]  ;;  %v139_v9 = vld [vmem:[#allocation5 + $0x2d8] sm:$0xff]  ;;  %v671_v10 = vpack.c.bf16 %v121_v7, %v120_v6  ;;  %v140_v14 = vld [vmem:[#allocation5 + $0x2e0] sm:$0xff] }
  0x46   :  { %620 = vmatpush3.bf16.msra.mxu0 %v619_v34  ;;  %v673_v11 = vpack.c.bf16 %v139_v9, %v138_v8  ;;  %v122_v12 = vld [vmem:[#allocation5 + $0x250] sm:$0xff]  ;;  %v123_v13 = vld [vmem:[#allocation5 + $0x258] sm:$0xff]  ;;  %v141_v15 = vld [vmem:[#allocation5 + $0x2e8] sm:$0xff] }
  0x47   :  { %654 = vmatprep.subr.bf16.mxu0 %v653_v36  ;;  %v675_v16 = vpack.c.bf16 %v123_v13, %v122_v12  ;;  %v677_v17 = vpack.c.bf16 %v141_v15, %v140_v14  ;;  %v124_v18 = vld [vmem:[#allocation5 + $0x260] sm:$0xff]  ;;  %v125_v19 = vld [vmem:[#allocation5 + $0x268] sm:$0xff]  ;;  %v142_v20 = vld [vmem:[#allocation5 + $0x2f0] sm:$0xff] }
  0x48   :  { %652 = vmatpush3.bf16.msra.mxu1 %v651_v35  ;;  %v143_v21 = vld [vmem:[#allocation5 + $0x2f8] sm:$0xff]  ;;  %v679_v22 = vpack.c.bf16 %v125_v19, %v124_v18  ;;  %v126_v24 = vld [vmem:[#allocation5 + $0x270] sm:$0xff]  ;;  %v45_v27 = vld [vmem:[#allocation2 + $0x20] sm:$0xff] }
  0x49   :  { %685 = vmatprep.subr.bf16.mxu1 %v776_v50  ;;  %222 = vmatmul.mubr.f32.vlgmr.msra.gmra.mrb[0].mxu0 %v41_v41  ;;  %v681_v23 = vpack.c.bf16 %v143_v21, %v142_v20  ;;  %v127_v25 = vld [vmem:[#allocation5 + $0x278] sm:$0xff]  ;;  %v472_v29 = vld [vmem:[%s848_s2] ss:$0 sm:$0xff]  ;;  %s779_s2 = smov [#allocation7]  }
  0x4a   :  { %656 = vmatpush3.bf16.msra.mxu0 %v655_v42  ;;  %361 = vmatprep.mubr.f32.mxu0 %v46_v49  ;;  %v683_v26 = vpack.c.bf16 %v127_v25, %v126_v24  ;;  %s462_s11 = sshll.u32 %s779_s2, 4  ;;  %s463_s11 = int_to_ptr.vmem [resolvable:$true] %s462_s11 }
  0x4b   :  { %292 = vmatmul.mubr.f32.vlgmr.msra.gmra.mrb[0].mxu1 %v43_v43  ;;  %658 = vmatprep.subr.bf16.mxu0 %v657_v45  ;;  %s744_s12 = scalar_lea.vmem %s463_s11, 128  ;;  %p749_p3 = scmp.lt.s32.totalorder %s463_s11, %s463_s11 }
  0x4c   :  { %687 = vmatpush3.bf16.msra.mxu1 %v686_v53  ;;  %586 = vmatprep.mubr.msk.f32.mxu1 %vm777_vm0, %v778_v60  ;;  %p745_p2 = scmp.ne.s32.totalorder %s463_s11, %s744_s12  ;;  %p750_p4 = scmp.lt.s32.totalorder %s744_s12, %s744_s12 }
  0x4e   :  { %660 = vmatpush3.bf16.msra.mxu0 %v659_v54  ;;  %p751_p5 = por %p750_p4, %p749_p3 }
  0x4f   :  { %662 = vmatprep.subr.bf16.mxu0 %v661_v55  ;;  %587 = vmatmul.mubr.msk.f32.vlgmr.msra.gmra.mrb[2].mxu1 %vm153_vm1, %v47_v61 }
  0x50   :  { %p752_p6 = pnand %p751_p5, %p745_p2 }
  0x52   :  { %664 = vmatpush3.bf16.msra.mxu0 %v663_v62 }
  0x53   :  { %666 = vmatprep.subr.bf16.mxu0 %v665_v63 }
  0x56   :  { %668 = vmatpush3.bf16.msra.mxu0 %v667_v4 }
  0x57   :  { %670 = vmatprep.subr.bf16.mxu0 %v669_v5 }
  0x5a   :  { %672 = vmatpush3.bf16.msra.mxu0 %v671_v10 }
  0x5b   :  { %674 = vmatprep.subr.bf16.mxu0 %v673_v11 }
  0x5e   :  { %676 = vmatpush3.bf16.msra.mxu0 %v675_v16 }
  0x5f   :  { %678 = vmatprep.subr.bf16.mxu0 %v677_v17 }
  0x62   :  { %680 = vmatpush3.bf16.msra.mxu0 %v679_v22 }
  0x63   :  { %682 = vmatprep.subr.bf16.mxu0 %v681_v23 }
  0x66   :  { %684 = vmatpush3.bf16.msra.mxu0 %v683_v26 }
  0x69   :  { %362 = vmatmul.mubr.f32.vlgmr.msra.gmra.mrb[2].mxu0 %v45_v27 }
 0x11c   :  { %v506_v28 = vpop.f32.mrb[0].mxu0 }
 0x11d   :  { %v507_v30 = vpop.f32.mrb[1].mxu0 }
 0x11e   :  { %v541_v31 = vpop.f32.mrb[0].mxu1  ;;  %v508_v32 = vadd.f32 %v507_v30, %v506_v28 }
 0x11f   :  { %v542_v33 = vpop.f32.mrb[1].mxu1 }
 0x120   :  { %v543_v34 = vadd.f32 %v542_v33, %v541_v31  ;;  %v224_v35 = vadd.f32 %v508_v32, %v472_v29 }
 0x122   :  { %v294_v36 = vadd.f32 %v543_v34, %v224_v35  ;;  %v433_v37 = vpop.f32.mrb[2].mxu1 }
 0x123   :  { %v588_v38 = vpop.f32.mrb[3].mxu1 }
 0x13c   :  { %v576_v39 = vpop.f32.mrb[2].mxu0 }
 0x13d   :  { %v577_v40 = vpop.f32.mrb[3].mxu0 }
 0x13e   :  { %v578_v41 = vadd.f32 %v577_v40, %v576_v39 }
 0x140   :  { %v364_v42 = vadd.f32 %v578_v41, %v294_v36 }
 0x142   :  { %v434_v43 = vadd.f32 %v433_v37, %v364_v42 }
 0x144   :  { %v437_v44 = vrot.slane %v434_v43, 4 }
 0x146   :  { %v438_v45 = vmax.f32 %v434_v43, %v437_v44 }
 0x148   :  { %v439_v46 = vrot.slane %v438_v45, 2 }
 0x14a   :  { %v440_v47 = vmax.f32 %v438_v45, %v439_v46 }
 0x14c   :  { %v441_v48 = vrot.slane %v440_v47, 1 }
 0x14e   :  { %v442_v49 = vmax.f32 %v440_v47, %v441_v48 }
 0x150   :  { %v443_v50 = vsub.f32 %v434_v43, %v442_v49 }
 0x152   :  { %v444_v51 = vmul.f32 1.442695, %v443_v50 }
 0x154   :  { %696 = vpow2.f32 %v444_v51 }
 0x15e   :  { %v697_v52 = vpop.eup %696 }
 0x15f   :  { %v446_v53 = vrot.slane %v697_v52, 4 }
 0x161   :  { %v447_v54 = vadd.f32 %v697_v52, %v446_v53 }
 0x163   :  { %v448_v55 = vrot.slane %v447_v54, 2 }
 0x165   :  { %v449_v56 = vadd.f32 %v448_v55, %v447_v54 }
 0x167   :  { %v450_v57 = vrot.slane %v449_v56, 1 }
 0x169   :  { %v451_v58 = vadd.f32 %v450_v57, %v449_v56 }
 0x16b   :  { %698 = vlog2.f32 %v451_v58 }
 0x175   :  { %v699_v59 = vpop.eup %698 }
 0x176   :  { %v453_v60 = vmul.f32 0.6931472, %v699_v59 }
 0x178   :  { %v454_v61 = vsub.f32 %v443_v50, %v453_v60 }
 0x17a   :  { %455 = vst [vmem:[#allocation7] sm:$0xff] %v454_v61 }
 0x17b   :  { %755 = shalt.err (!%p752_p6)
}
 0x17c   :  { %s756_s15 = scalar_lea.hbm %s849_s3, 128 }
 0x17d   :  { %p757_p7 = scmp.ne.s32.totalorder %s849_s3, %s756_s15  ;;  %p760_p8 = scmp.lt.u32.totalorder %s756_s15, %s849_s3 }
 0x17f   :  { %p762_p9 = pnand %p760_p8, %p757_p7 }
 0x181   :  { %765 = shalt.err (!%p762_p9)
}
 0x182   :  { %465 = dma.vmem_to_hbm [thread:$0]  %s463_s11, 128, %s849_s3, [#allocation4]  }
 0x183   :  { %770 = dma.done.wait [#allocation4], 128  }
 0x184   :  { %771 = vsyncadd [#allocation4], 4294967168 }
 0x185   :  { %469 = vsyncpa [#allocation3], 1 }
 0x186   :  { %470 = vsyncpa [#allocation6], 1 }
 0x187   :  { %471 = vsyncpa [#allocation4], 1 }

</bundles_post_ra>
